<compile_context>
chip_gen: v7x
topology: tpu7x:2x2x1
jax: 0.10.0
libtpu: 0.0.40
codegen_flags: <defaults>
</compile_context>

<pallas_src>
import functools

import jax
import jax.numpy as jnp
from jax.experimental import pallas as pl
from jax.experimental.pallas import tpu as pltpu


def _round_up(x: int, m: int) -> int:
    return ((x + m - 1) // m) * m


def _vmem_capacity_bytes() -> int:
    """Physical VMEM per TensorCore; conservative 64 MiB (v7x) fallback if unavailable."""
    try:
        info = pltpu.get_tpu_info()
        cap = getattr(info, "vmem_capacity_bytes", None)
        if cap:
            return int(cap)
    except Exception:
        pass
    return 64 * 1024 * 1024


def _choose_tile_rows(batch: int, n_classes: int, in_itemsize: int, budget_bytes: int,
                      input_buffers: int = 2, max_rows: int = 4096) -> int:
    # Streamed inputs: student + teacher, `input_buffers`-deep pipeline, plus ~6 live f32
    # (TB, C) temporaries after the algebraic trims (matches the wrapper's `est`).
    per_row = n_classes * (2 * input_buffers * in_itemsize + 6 * 4) + 64
    rows = budget_bytes // max(per_row, 1)
    rows = max(8, min(max_rows, (rows // 8) * 8))
    rows = min(rows, _round_up(batch, 8))
    return int(rows)


def _distill_kernel(student_ref, teacher_ref, labels_ref, out_ref, *,
                    inv_T: float, soft_coef: float, one_m_a: float,
                    w_sel: float, w_other: float, int_T,
                    batch_size: int, tile_rows: int, need_mask: bool):
    s = student_ref[...].astype(jnp.float32)           # (TB, C) — bf16 or f32 input tile
    t = teacher_ref[...].astype(jnp.float32)           # (TB, C)
    labels = labels_ref[...]                            # (TB, 1) int32
    TB, C = s.shape

    # ---- student: one row max shared by the plain and temperature-scaled softmaxes ----
    m = jnp.max(s, axis=1, keepdims=True)               # (TB, 1)
    sh = s - m                                           # plain shifted logits
    sh_T = sh * inv_T                                    # (s - max s) / T
    exp_shT = jnp.exp(sh_T)
    lse_T = jnp.log(jnp.sum(exp_shT, axis=1, keepdims=True))

    if int_T is not None:
        # exp(sh) == exp(sh/T) ** T exactly for integer T: reuse exp_shT, trade one EUP exp
        # per element for a couple of cheap VPU multiplies.
        exp_sh = exp_shT
        for _ in range(int_T - 1):
            exp_sh = exp_sh * exp_shT
    else:
        exp_sh = jnp.exp(sh)
    lse = jnp.log(jnp.sum(exp_sh, axis=1, keepdims=True))   # plain log-sum-exp

    # ---- teacher softened distribution (no log_p_t / p_t materialized) ----
    t_max = jnp.max(t, axis=1, keepdims=True)
    th_T = (t - t_max) * inv_T
    exp_t = jnp.exp(th_T)
    t_sum = jnp.sum(exp_t, axis=1, keepdims=True)
    inv_t_sum = 1.0 / t_sum                              # (TB, 1) — per-row, not per-element
    log_t_sum = jnp.log(t_sum)

    # ---- soft KL numerator: the per-row constant (lse_T - log t_sum) is added AFTER the
    #      lane reduction (sum_c p_t == 1), and the 1/t_sum scale applied per-row. ----
    soft_num = jnp.sum(exp_t * (th_T - sh_T), axis=1, keepdims=True)

    # ---- label-smoothed CE, fused weighting (no one-hot / q / sel_sh materialized):
    #      one_m_a * hard_b = one_m_a * lse_b - sum_c w_c * sh_c  ----
    cls_idx = jax.lax.broadcasted_iota(jnp.int32, (TB, C), 1)
    w = jnp.where(cls_idx == labels, w_sel, w_other)
    hard_wsum = jnp.sum(w * sh, axis=1, keepdims=True)

    # ---- per-row total (scalar constants pre-folded as Python floats) ----
    row = soft_coef * (inv_t_sum * soft_num + lse_T - log_t_sum) \
        + one_m_a * lse - hard_wsum                      # (TB, 1)

    if need_mask:
        # Mask rows beyond the true (global) batch — padding added by the wrapper.
        row0 = pl.program_id(0) * tile_rows
        row_idx = row0 + jax.lax.broadcasted_iota(jnp.int32, (TB, 1), 0)
        row = jnp.where(row_idx < batch_size, row, 0.0)

    tile_sum = jnp.sum(row)                              # scalar partial (not yet / B)
    out_ref[...] = jnp.broadcast_to(tile_sum, out_ref.shape).astype(out_ref.dtype)


def distillation_loss(student_logits, teacher_logits, labels,
                      temperature=3.0, alpha=0.7, label_smoothing=0.1,
                      tile_rows=None, input_buffers=2, vmem_budget_bytes=None):
    """Pallas implementation of DistillationLoss.forward. Returns a scalar f32."""
    B, C = student_logits.shape
    assert teacher_logits.shape == (B, C)

    itemsize = max(jnp.dtype(student_logits.dtype).itemsize,
                   jnp.dtype(teacher_logits.dtype).itemsize)

    vmem_cap = _vmem_capacity_bytes()
    if vmem_budget_bytes is None:
        # ~44 MiB streamed-tile budget on 128 MiB parts (v5e/v6e), ~21 MiB on 64 MiB (v7x).
        vmem_budget_bytes = min(44 << 20, vmem_cap // 3)

    bufs = max(2, int(input_buffers))
    if tile_rows is None:
        tile_rows = _choose_tile_rows(B, C, itemsize, int(vmem_budget_bytes), bufs)
    TB = max(8, _round_up(min(int(tile_rows), _round_up(B, 8)), 8))

    # v7x has 2 TensorCores: make sure the "parallel" batch axis has >= 2 tiles when possible.
    B_pad = _round_up(B, TB)
    if B_pad // TB < 2 and TB >= 16:
        TB = _round_up(TB // 2, 8)
        B_pad = _round_up(B, TB)
    num_tiles = B_pad // TB
    pad = B_pad - B

    # Deeper-than-double buffering only pays when the per-step DMA is short (tile <= ~1 MiB);
    # otherwise spend the VMEM on a larger tile.
    if bufs != 2 and TB * C * itemsize > (1 << 20):
        bufs = 2

    labels_i32 = labels.astype(jnp.int32).reshape(B, 1)
    if pad:
        student_logits = jnp.pad(student_logits, ((0, pad), (0, 0)))
        teacher_logits = jnp.pad(teacher_logits, ((0, pad), (0, 0)))
        labels_i32 = jnp.pad(labels_i32, ((0, pad), (0, 0)))

    # ---- pre-fold scalar constants at trace time ----
    T = float(temperature)
    rT = round(T)
    int_T = int(rT) if (abs(T - rT) < 1e-12 and 1 <= rT <= 8) else None
    eps = float(label_smoothing)
    a = float(alpha)
    one_m_a = 1.0 - a

    kernel = functools.partial(
        _distill_kernel,
        inv_T=1.0 / T,
        soft_coef=a * T * T,
        one_m_a=one_m_a,
        w_sel=one_m_a * (1.0 - eps) + one_m_a * eps / C,
        w_other=one_m_a * eps / C,
        int_T=int_T,
        batch_size=B,                 # divide by the GLOBAL batch size, not the tile's
        tile_rows=TB,
        need_mask=(pad != 0),
    )

    def _logits_spec():
        if bufs != 2:
            return pl.BlockSpec((TB, C), lambda i: (i, 0),
                                pipeline_mode=pl.Buffered(bufs))
        return pl.BlockSpec((TB, C), lambda i: (i, 0))

    # VMEM estimate: pipelined input tiles + ~6 live f32 (TB, C) temporaries (matches
    # _choose_tile_rows), clamped generation-aware below physical VMEM.
    est = TB * C * (2 * bufs * itemsize + 6 * 4) + (1 << 20)
    vmem_limit = int(min(max(est + (4 << 20), 32 << 20), vmem_cap - (12 << 20), 100 << 20))
    vmem_limit = max(vmem_limit, 16 << 20)

    partials = pl.pallas_call(
        kernel,
        out_shape=jax.ShapeDtypeStruct((num_tiles, 8, 128), jnp.float32),
        grid_spec=pltpu.PrefetchScalarGridSpec(
            num_scalar_prefetch=0,
            grid=(num_tiles,),
            in_specs=[
                _logits_spec(),                               # student (TB, C)
                _logits_spec(),                               # teacher (TB, C)
                pl.BlockSpec((TB, 1), lambda i: (i, 0)),      # labels  (TB, 1) int32
            ],
            out_specs=pl.BlockSpec((1, 8, 128), lambda i: (i, 0, 0)),
        ),
        compiler_params=pltpu.CompilerParams(
            dimension_semantics=("parallel",),
            vmem_limit_bytes=vmem_limit,
        ),
    )(student_logits, teacher_logits, labels_i32)

    return jnp.sum(partials[:, 0, 0]) / jnp.float32(B)


def _reference_loss(student, teacher, labels, temperature=3.0, alpha=0.7, label_smoothing=0.1):
    """Pure-JAX reference matching the PyTorch module."""
    s = student.astype(jnp.float32)
    t = teacher.astype(jnp.float32)
    B, C = s.shape
    T = temperature
    log_p_s = jax.nn.log_softmax(s / T, axis=1)
    p_t = jax.nn.softmax(t / T, axis=1)
    log_p_t = jax.nn.log_softmax(t / T, axis=1)
    soft = jnp.sum(p_t * (log_p_t - log_p_s)) / B * (T * T)
    log_p = jax.nn.log_softmax(s, axis=1)
    onehot = jax.nn.one_hot(labels, C, dtype=jnp.float32)
    q = (1.0 - label_smoothing) * onehot + label_smoothing / C
    hard = -jnp.sum(q * log_p) / B
    return alpha * soft + (1.0 - alpha) * hard


if __name__ == "__main__":
    k1, k2, k3, k4, k5, k6 = jax.random.split(jax.random.PRNGKey(0), 6)

    # Case 1: small aligned shapes (single tile), default integer temperature.
    B, C = 8, 128
    student = jax.random.normal(k1, (B, C), dtype=jnp.float32)
    teacher = jax.random.normal(k2, (B, C), dtype=jnp.float32)
    labels = jax.random.randint(k3, (B,), 0, C, dtype=jnp.int32)
    loss = distillation_loss(student, teacher, labels, temperature=3.0, alpha=0.7)
    jax.block_until_ready(loss)
    ref = _reference_loss(student, teacher, labels, temperature=3.0, alpha=0.7)
    assert jnp.allclose(loss, ref, rtol=1e-4, atol=1e-4), (float(loss), float(ref))

    # Case 2: unaligned batch + multi-tile parallel grid (exercises padding mask).
    B2, C2 = 37, 256
    s2 = jax.random.normal(k4, (B2, C2), dtype=jnp.float32)
    t2 = jax.random.normal(k5, (B2, C2), dtype=jnp.float32)
    y2 = jax.random.randint(k6, (B2,), 0, C2, dtype=jnp.int32)
    loss2 = distillation_loss(s2, t2, y2, tile_rows=16)
    jax.block_until_ready(loss2)
    ref2 = _reference_loss(s2, t2, y2)
    assert jnp.allclose(loss2, ref2, rtol=1e-4, atol=1e-4), (float(loss2), float(ref2))

    # Case 3: bf16 logits streamed end-to-end (no wrapper upcast; f32 math in-kernel).
    s3 = student.astype(jnp.bfloat16)
    t3 = teacher.astype(jnp.bfloat16)
    loss3 = distillation_loss(s3, t3, labels)
    jax.block_until_ready(loss3)
    ref3 = _reference_loss(s3, t3, labels)
    assert jnp.allclose(loss3, ref3, rtol=1e-4, atol=1e-4), (float(loss3), float(ref3))

    # Case 4: non-integer temperature (exercises the generic two-exp student path).
    loss4 = distillation_loss(student, teacher, labels, temperature=2.5, alpha=0.4)
    jax.block_until_ready(loss4)
    ref4 = _reference_loss(student, teacher, labels, temperature=2.5, alpha=0.4)
    assert jnp.allclose(loss4, ref4, rtol=1e-4, atol=1e-4), (float(loss4), float(ref4))

    print("KERNEL_OK")
</pallas_src>

<mosaic_0001>
module attributes {stable_mosaic.version = 11 : i64} {
  func.func @_distill_kernel(%arg0: i32, %arg1: memref<8x128xf32, #tpu.memory_space<vmem>>, %arg2: memref<8x128xf32, #tpu.memory_space<vmem>>, %arg3: memref<8x1xi32, #tpu.memory_space<vmem>>, %arg4: memref<1x8x128xf32, #tpu.memory_space<vmem>>) attributes {dimension_semantics = [#tpu.dimension_semantics<parallel>], iteration_bounds = array<i64: 1>, scalar_prefetch = 0 : i64, scratch_operands = 0 : i64, tpu.core_type = #tpu.core_type<tc>, window_params = [{transform_indices = @transform_0, window_bounds = array<i64: 8, 128>}, {transform_indices = @transform_1, window_bounds = array<i64: 8, 128>}, {transform_indices = @transform_2, window_bounds = array<i64: 8, 1>}, {transform_indices = @transform_3, window_bounds = array<i64: 1, 8, 128>}]} {
    %c0 = arith.constant 0 : index
    %c0_0 = arith.constant 0 : index
    %0 = vector.load %arg1[%c0, %c0_0] : memref<8x128xf32, #tpu.memory_space<vmem>>, vector<8x128xf32>
    %c0_1 = arith.constant 0 : index
    %c0_2 = arith.constant 0 : index
    %1 = vector.load %arg2[%c0_1, %c0_2] : memref<8x128xf32, #tpu.memory_space<vmem>>, vector<8x128xf32>
    %c0_3 = arith.constant 0 : index
    %c0_4 = arith.constant 0 : index
    %2 = vector.load %arg3[%c0_3, %c0_4] : memref<8x1xi32, #tpu.memory_space<vmem>>, vector<8x1xi32>
    %cst = arith.constant dense<0xFF800000> : vector<8xf32>
    %3 = vector.multi_reduction <maximumf>, %0, %cst [1] : vector<8x128xf32> to vector<8xf32>
    %4 = vector.shape_cast %3 : vector<8xf32> to vector<8x1xf32>
    %5 = vector.broadcast %4 : vector<8x1xf32> to vector<8x128xf32>
    %6 = arith.subf %0, %5 : vector<8x128xf32>
    %cst_5 = arith.constant 0.333333343 : f32
    %7 = vector.broadcast %cst_5 : f32 to vector<8x128xf32>
    %8 = arith.mulf %6, %7 : vector<8x128xf32>
    %9 = math.exp %8 : vector<8x128xf32>
    %cst_6 = arith.constant dense<0.000000e+00> : vector<8xf32>
    %10 = vector.multi_reduction <add>, %9, %cst_6 [1] : vector<8x128xf32> to vector<8xf32>
    %11 = vector.shape_cast %10 : vector<8xf32> to vector<8x1xf32>
    %12 = math.log %11 : vector<8x1xf32>
    %13 = arith.mulf %9, %9 : vector<8x128xf32>
    %14 = arith.mulf %13, %9 : vector<8x128xf32>
    %cst_7 = arith.constant dense<0.000000e+00> : vector<8xf32>
    %15 = vector.multi_reduction <add>, %14, %cst_7 [1] : vector<8x128xf32> to vector<8xf32>
    %16 = vector.shape_cast %15 : vector<8xf32> to vector<8x1xf32>
    %17 = math.log %16 : vector<8x1xf32>
    %cst_8 = arith.constant dense<0xFF800000> : vector<8xf32>
    %18 = vector.multi_reduction <maximumf>, %1, %cst_8 [1] : vector<8x128xf32> to vector<8xf32>
    %19 = vector.shape_cast %18 : vector<8xf32> to vector<8x1xf32>
    %20 = vector.broadcast %19 : vector<8x1xf32> to vector<8x128xf32>
    %21 = arith.subf %1, %20 : vector<8x128xf32>
    %cst_9 = arith.constant 0.333333343 : f32
    %22 = vector.broadcast %cst_9 : f32 to vector<8x128xf32>
    %23 = arith.mulf %21, %22 : vector<8x128xf32>
    %24 = math.exp %23 : vector<8x128xf32>
    %cst_10 = arith.constant dense<0.000000e+00> : vector<8xf32>
    %25 = vector.multi_reduction <add>, %24, %cst_10 [1] : vector<8x128xf32> to vector<8xf32>
    %26 = vector.shape_cast %25 : vector<8xf32> to vector<8x1xf32>
    %cst_11 = arith.constant 1.000000e+00 : f32
    %27 = vector.broadcast %cst_11 : f32 to vector<8x1xf32>
    %28 = arith.divf %27, %26 : vector<8x1xf32>
    %29 = math.log %26 : vector<8x1xf32>
    %30 = arith.subf %23, %8 : vector<8x128xf32>
    %31 = arith.mulf %24, %30 : vector<8x128xf32>
    %cst_12 = arith.constant dense<0.000000e+00> : vector<8xf32>
    %32 = vector.multi_reduction <add>, %31, %cst_12 [1] : vector<8x128xf32> to vector<8xf32>
    %33 = vector.shape_cast %32 : vector<8xf32> to vector<8x1xf32>
    %34 = tpu.iota {dimensions = array<i32: 1>} : vector<8x128xi32>
    %35 = vector.broadcast %2 : vector<8x1xi32> to vector<8x128xi32>
    %36 = arith.cmpi eq, %34, %35 : vector<8x128xi32>
    %cst_13 = arith.constant 0.270234376 : f32
    %cst_14 = arith.constant 2.343750e-04 : f32
    %37 = vector.broadcast %cst_13 : f32 to vector<8x128xf32>
    %38 = vector.broadcast %cst_14 : f32 to vector<8x128xf32>
    %39 = arith.select %36, %37, %38 : vector<8x128xi1>, vector<8x128xf32>
    %40 = arith.mulf %39, %6 : vector<8x128xf32>
    %cst_15 = arith.constant dense<0.000000e+00> : vector<8xf32>
    %41 = vector.multi_reduction <add>, %40, %cst_15 [1] : vector<8x128xf32> to vector<8xf32>
    %42 = vector.shape_cast %41 : vector<8xf32> to vector<8x1xf32>
    %43 = arith.mulf %28, %33 : vector<8x1xf32>
    %44 = arith.addf %43, %12 : vector<8x1xf32>
    %45 = arith.subf %44, %29 : vector<8x1xf32>
    %cst_16 = arith.constant 6.300000e+00 : f32
    %46 = vector.broadcast %cst_16 : f32 to vector<8x1xf32>
    %47 = arith.mulf %46, %45 : vector<8x1xf32>
    %cst_17 = arith.constant 3.000000e-01 : f32
    %48 = vector.broadcast %cst_17 : f32 to vector<8x1xf32>
    %49 = arith.mulf %48, %17 : vector<8x1xf32>
    %50 = arith.addf %47, %49 : vector<8x1xf32>
    %51 = arith.subf %50, %42 : vector<8x1xf32>
    %52 = vector.shape_cast %51 : vector<8x1xf32> to vector<1x8x1xf32>
    %cst_18 = arith.constant dense<0.000000e+00> : vector<1xf32>
    %53 = vector.multi_reduction <add>, %52, %cst_18 [1, 2] : vector<1x8x1xf32> to vector<1xf32>
    %54 = vector.shape_cast %53 : vector<1xf32> to vector<1x1x1xf32>
    %55 = vector.extract %54[0, 0, 0] : f32 from vector<1x1x1xf32>
    %56 = vector.broadcast %55 : f32 to vector<1x8x128xf32>
    %c0_19 = arith.constant 0 : index
    %c0_20 = arith.constant 0 : index
    %c0_21 = arith.constant 0 : index
    %57 = vector.load %arg4[%c0_19, %c0_20, %c0_21] : memref<1x8x128xf32, #tpu.memory_space<vmem>>, vector<1x8x128xf32>
    tpu.vector_store %arg4[%c0_19, %c0_20, %c0_21], %56 {strides = array<i32>} : memref<1x8x128xf32, #tpu.memory_space<vmem>>, vector<1x8x128xf32>,
    return
  }
  func.func @transform_0(%arg0: i32) -> (i32, i32) {
    %c0_i32 = arith.constant 0 : i32
    %c0_i32_0 = arith.constant 0 : i32
    return %arg0, %c0_i32 : i32, i32
  }
  func.func @transform_1(%arg0: i32) -> (i32, i32) {
    %c0_i32 = arith.constant 0 : i32
    %c0_i32_0 = arith.constant 0 : i32
    return %arg0, %c0_i32 : i32, i32
  }
  func.func @transform_2(%arg0: i32) -> (i32, i32) {
    %c0_i32 = arith.constant 0 : i32
    %c0_i32_0 = arith.constant 0 : i32
    return %arg0, %c0_i32 : i32, i32
  }
  func.func @transform_3(%arg0: i32) -> (i32, i32, i32) {
    %c0_i32 = arith.constant 0 : i32
    %c0_i32_0 = arith.constant 0 : i32
    %c0_i32_1 = arith.constant 0 : i32
    return %arg0, %c0_i32, %c0_i32_0 : i32, i32, i32
  }
}

</mosaic_0001>

<bundles_post_ra>
// kernel: tpu_custom_call.1
= control target key start
LH: loop header
LB: loop body
LE: loop exit
PB: predicated region body
PF: predicated region fallthrough
CT: control target
= control target key end

     0   :  { %8 = vsyncpa [#allocation3], 0  ;;  %s229_s0 = inlined_call_operand.vmem [shape: f32[8,128], index: 0, kind: input, shape index: {}]   ;;  %s230_s1 = inlined_call_operand.hbm [shape: f32[8,128], index: 1, kind: input, shape index: {}]   ;;  %s231_s2 = inlined_call_operand.vmem [shape: s32[8,1], index: 2, kind: input, shape index: {}]   ;;  %s232_s3 = inlined_call_operand.hbm [shape: f32[1,8,128], index: 3, kind: output, shape index: {}]  }
   0x1   :  { %9 = vsyncpa [#allocation4], 0  ;;  %s175_s12 = smov [#allocation2]   ;;  %s127_s16 = scalar_lea.hbm %s230_s1, 128 }
   0x2   :  { %s18_s13 = sshll.u32 %s175_s12, 4  ;;  %p128_p0 = scmp.ne.s32.totalorder %s230_s1, %s127_s16  ;;  %s19_s13 = int_to_ptr.vmem [resolvable:$true] %s18_s13 }
   0x3   :  { %p131_p1 = scmp.lt.u32.totalorder %s127_s16, %s230_s1 }
   0x5   :  { %p133_p2 = pnand %p131_p1, %p128_p0 }
   0x7   :  { %136 = shalt.err (!%p133_p2)
}
   0x8   :  { %s137_s21 = scalar_lea.vmem %s19_s13, 128  ;;  %p142_p4 = scmp.lt.s32.totalorder %s19_s13, %s19_s13 }
   0x9   :  { %p138_p3 = scmp.ne.s32.totalorder %s19_s13, %s137_s21  ;;  %p143_p5 = scmp.lt.s32.totalorder %s137_s21, %s137_s21 }
   0xb   :  { %p144_p6 = por %p143_p5, %p142_p4 }
   0xd   :  { %p145_p7 = pnand %p144_p6, %p138_p3 }
   0xf   :  { %148 = shalt.err (!%p145_p7)
}
  0x10   :  { %21 = dma.hbm_to_vmem [thread:$0]  %s230_s1, 128, %s19_s13, [#allocation3]  }
  0x11   :  { %171 = dma.done.wait [#allocation3], 128  }
  0x12   :  { %172 = vsyncadd [#allocation3], 4294967168  ;;  %v176_v0 = vmov 0   ;;  %v27_v1 = vld [vmem:[%s229_s0] sm:$0xff]  ;;  %v62_v13 = vlaneseq  ;;  %v177_v21 = vmov 0.000234375  }
  0x13   :  { %113 = vset.pattern.permute.xlu1 %v176_v0  ;;  %114 = vset.pattern.permute.xlu0 %v176_v0  ;;  %v29_v2 = vld [vmem:[%s231_s2] sm:$0xff]  ;;  %vm79_vm1 = vcmask 7168   ;;  %s178_s0 = smov [#allocation5]  }
  0x14   :  { %30 = vmax.xlane.f32.xlu0 %v27_v1  ;;  %65 = vperm.xlu1 %113, %v29_v2   ;;  %v28_v3 = vld [vmem:[#allocation2] sm:$0xff]  ;;  %v63_v16 = vand.u32 127, %v62_v13  ;;  %s98_s1 = sshll.u32 %s178_s0, 4  ;;  %s99_s1 = int_to_ptr.vmem [resolvable:$true] %s98_s1 }
  0x15   :  { %s149_s28 = scalar_lea.vmem %s99_s1, 128  ;;  %p154_p9 = scmp.lt.s32.totalorder %s99_s1, %s99_s1 }
  0x16   :  { %p150_p8 = scmp.ne.s32.totalorder %s99_s1, %s149_s28  ;;  %p155_p10 = scmp.lt.s32.totalorder %s149_s28, %s149_s28 }
  0x18   :  { %46 = vmax.xlane.f32.xlu0 %v28_v3  ;;  %p156_p11 = por %p155_p10, %p154_p9 }
  0x1a   :  { %p157_p12 = pnand %p156_p11, %p150_p8 }
  0x93   :  { %v66_v17 = vpop.permute.xlu1 %65 }
  0x94   :  { %vm67_vm0 = vcmp.eq.s32.totalorder %v63_v16, %v66_v17 }
  0x95   :  { %v68_v22 = vsel %vm67_vm0, 0.27023438, %v177_v21 }
  0xa1   :  { %v31_v4 = vpop.xlane.xlu0 %30 }
  0xa2   :  { %v32_v5 = vsub.f32 %v27_v1, %v31_v4 }
  0xa4   :  { %v33_v6 = vmul.f32 0.33333334, %v32_v5  ;;  %v69_v23 = vmul.f32 %v68_v22, %v32_v5 }
  0xa5   :  { %v47_v7 = vpop.xlane.xlu0 %46 }
  0xa6   :  { %v34_v8 = vmul.f32 1.442695, %v33_v6  ;;  %v48_v9 = vsub.f32 %v28_v3, %v47_v7 }
  0xa8   :  { %115 = vpow2.f32 %v34_v8  ;;  %v49_v10 = vmul.f32 0.33333334, %v48_v9 }
  0xaa   :  { %v50_v11 = vmul.f32 1.442695, %v49_v10  ;;  %v58_v19 = vsub.f32 %v49_v10, %v33_v6 }
  0xac   :  { %117 = vpow2.f32 %v50_v11 }
  0xb2   :  { %v116_v12 = vpop.eup %115 }
  0xb3   :  { %36 = vadd.xlane.f32.xlu1 %v116_v12  ;;  %v40_v14 = vmul.f32 %v116_v12, %v116_v12 }
  0xb5   :  { %v41_v18 = vmul.f32 %v116_v12, %v40_v14 }
  0xb6   :  { %v118_v15 = vpop.eup %117 }
  0xb7   :  { %52 = vadd.xlane.f32.xlu0 %v118_v15  ;;  %v59_v20 = vmul.f32 %v118_v15, %v58_v19 }
  0xbb   :  { %42 = vadd.xlane.f32.xlu0 %v41_v18 }
  0xbf   :  { %60 = vadd.xlane.f32.xlu0 %v59_v20 }
  0xc3   :  { %70 = vadd.xlane.f32.xlu0 %v69_v23 }
 0x140   :  { %v37_v24 = vpop.xlane.xlu1 %36 }
 0x141   :  { %119 = vlog2.f32 %v37_v24 }
 0x144   :  { %v53_v25 = vpop.xlane.xlu0 %52 }
 0x145   :  { %121 = vrcp.f32 %v53_v25 }
 0x146   :  { %123 = vlog2.f32 %v53_v25 }
 0x148   :  { %v43_v26 = vpop.xlane.xlu0 %42 }
 0x149   :  { %125 = vlog2.f32 %v43_v26 }
 0x14b   :  { %v120_v27 = vpop.eup %119 }
 0x14c   :  { %v61_v29 = vpop.xlane.xlu0 %60  ;;  %v39_v31 = vmul.f32 0.6931472, %v120_v27 }
 0x14f   :  { %v122_v28 = vpop.eup %121 }
 0x150   :  { %v124_v30 = vpop.eup %123  ;;  %v72_v32 = vmul.f32 %v122_v28, %v61_v29  ;;  %v71_v41 = vpop.xlane.xlu0 %70 }
 0x151   :  { %v57_v33 = vmul.f32 0.6931472, %v124_v30 }
 0x152   :  { %v73_v34 = vadd.f32 %v72_v32, %v39_v31 }
 0x153   :  { %v126_v35 = vpop.eup %125 }
 0x154   :  { %v45_v36 = vmul.f32 0.6931472, %v126_v35  ;;  %v74_v37 = vsub.f32 %v73_v34, %v57_v33 }
 0x156   :  { %v76_v38 = vmul.f32 0.3, %v45_v36  ;;  %v75_v39 = vmul.f32 6.3, %v74_v37 }
 0x158   :  { %v77_v40 = vadd.f32 %v76_v38, %v75_v39 }
 0x15a   :  { %v78_v42 = vsub.f32 %v77_v40, %v71_v41 }
 0x15c   :  { %v80_v43 = vsel %vm79_vm1, %v78_v42, 0.0 }
 0x15d   :  { %81 = vadd.xlane.f32.xlu0 %v80_v43 }
 0x1ea   :  { %v82_v44 = vpop.xlane.xlu0 %81 }
 0x1eb   :  { %v83_v45 = vrot.slane %v82_v44, 4 }
 0x1ed   :  { %v84_v46 = vadd.f32 %v83_v45, %v82_v44 }
 0x1ef   :  { %v85_v47 = vrot.slane %v84_v46, 2 }
 0x1f1   :  { %v86_v48 = vadd.f32 %v85_v47, %v84_v46 }
 0x1f3   :  { %v87_v49 = vrot.slane %v86_v48, 1 }
 0x1f5   :  { %v88_v50 = vadd.f32 %v87_v49, %v86_v48 }
 0x1f7   :  { %107 = vpush %v88_v50 }
 0x228   :  { %s108_s2 = spop %107 }
 0x229   :  { %v90_v51 = vstv %s108_s2 }
 0x22a   :  { %91 = vst [vmem:[#allocation5] sm:$0xff] %v90_v51 }
 0x22b   :  { %160 = shalt.err (!%p157_p12)
}
 0x22c   :  { %s161_s4 = scalar_lea.hbm %s232_s3, 128 }
 0x22d   :  { %p162_p13 = scmp.ne.s32.totalorder %s232_s3, %s161_s4  ;;  %p165_p0 = scmp.lt.u32.totalorder %s161_s4, %s232_s3 }
 0x22f   :  { %p167_p1 = pnand %p165_p0, %p162_p13 }
 0x231   :  { %170 = shalt.err (!%p167_p1)
}
 0x232   :  { %101 = dma.vmem_to_hbm [thread:$0]  %s99_s1, 128, %s232_s3, [#allocation4]  }
 0x233   :  { %173 = dma.done.wait [#allocation4], 128  }
 0x234   :  { %174 = vsyncadd [#allocation4], 4294967168 }
 0x235   :  { %105 = vsyncpa [#allocation3], 1 }
 0x236   :  { %106 = vsyncpa [#allocation4], 1 }

</bundles_post_ra>
